<compile_context>
chip_gen: v7x
topology: tpu7x:2x2x1
jax: 0.10.0
libtpu: 0.0.40
codegen_flags: <defaults>
</compile_context>

<pallas_src>
import jax
import jax.numpy as jnp
from jax.experimental import pallas as pl
from jax.experimental.pallas import tpu as pltpu


def _copy_kernel(x_ref, o_ref):
    # Pure identity copy of one lane-dense VMEM tile.
    o_ref[...] = x_ref[...]


def _choose_2d_layout(total_elems: int, w: int):
    """Pick a lane-dense (rows, cols) factorization of the flat buffer."""
    # Prefer the largest lane width <= 2048 that is a multiple of 128 and
    # divides the element count (unmasked, aligned stores).
    for cols in range(2048, 0, -128):
        if total_elems % cols == 0:
            return total_elems // cols, cols
    # Fallback: the natural output-flattened shape (always a valid full-dim
    # block, just possibly lane-sparse).
    return total_elems // (2 * w), 2 * w


def _choose_tile_rows(rows: int, cols: int, itemsize: int):
    """Row-tile of roughly 1 MiB; must divide `rows` and (if tiling) be %8."""
    target_bytes = 1 << 20  # ~1 MiB per tile -> ~4 MiB double-buffered in+out
    target_rows = max(1, target_bytes // max(1, cols * itemsize))
    if rows <= target_rows:
        return rows  # single full-extent block (always legal)
    tr = (target_rows // 8) * 8
    while tr >= 8:
        if rows % tr == 0:
            return tr
        tr -= 8
    return rows  # no divisor found; fall back to one full block


def pixel_shuffle(x, upscale_factor: int = 2):
    # The reference module's forward hard-codes the factor 2; reject anything
    # else instead of silently producing different semantics.
    if upscale_factor != 2:
        raise ValueError("This PixelShuffle variant only supports upscale_factor=2")
    n, c, w = x.shape
    assert c % 2 == 0, "channel dim must be even"
    c_out, w_out = c // 2, w * 2

    itemsize = jnp.dtype(x.dtype).itemsize
    total = n * c * w
    rows, cols = _choose_2d_layout(total, w)
    tile_rows = _choose_tile_rows(rows, cols, itemsize)
    grid = (rows // tile_rows,)

    tile_bytes = tile_rows * cols * itemsize
    # Double-buffered input + output tiles plus slack; clamp to v7x's 64 MiB.
    vmem_limit = int(min(64 * 1024 * 1024, max(8 * 1024 * 1024, 6 * tile_bytes)))

    x2d = jnp.reshape(x, (rows, cols))  # contiguous reshape: metadata only

    out2d = pl.pallas_call(
        _copy_kernel,
        out_shape=jax.ShapeDtypeStruct((rows, cols), x.dtype),
        grid=grid,
        in_specs=[pl.BlockSpec((tile_rows, cols), lambda i: (i, 0))],
        out_specs=pl.BlockSpec((tile_rows, cols), lambda i: (i, 0)),
        input_output_aliases={0: 0},  # output buffer is the (donated) input
        compiler_params=pltpu.CompilerParams(
            dimension_semantics=("parallel",),
            vmem_limit_bytes=vmem_limit,
        ),
    )(x2d)

    return jnp.reshape(out2d, (n, c_out, w_out))  # metadata only


if __name__ == "__main__":
    key = jax.random.PRNGKey(0)
    # Small shapes consistent with the module's 3-D forward: (n, c, w).
    x = jax.random.normal(key, (2, 4, 16), dtype=jnp.float32)

    out = jax.block_until_ready(pixel_shuffle(x, upscale_factor=2))

    # Reference: the pure row-major view semantics of the PyTorch module.
    ref = jnp.reshape(x, (x.shape[0], x.shape[1] // 2, x.shape[2] * 2))
    assert out.shape == ref.shape, (out.shape, ref.shape)
    assert out.dtype == ref.dtype
    assert jnp.array_equal(out, ref), "mismatch vs reference view"

    print("KERNEL_OK")
</pallas_src>

<mosaic_0001>
module attributes {stable_mosaic.version = 11 : i64} {
  func.func @_copy_kernel(%arg0: i32, %arg1: memref<1x128xf32, #tpu.memory_space<vmem>>, %arg2: memref<1x128xf32, #tpu.memory_space<vmem>>) attributes {dimension_semantics = [#tpu.dimension_semantics<parallel>], iteration_bounds = array<i64: 1>, scalar_prefetch = 0 : i64, scratch_operands = 0 : i64, tpu.core_type = #tpu.core_type<tc>, window_params = [{transform_indices = @transform_0, window_bounds = array<i64: 1, 128>}, {transform_indices = @transform_1, window_bounds = array<i64: 1, 128>}]} {
    %c0 = arith.constant 0 : index
    %c0_0 = arith.constant 0 : index
    %0 = vector.load %arg1[%c0, %c0_0] : memref<1x128xf32, #tpu.memory_space<vmem>>, vector<1x128xf32>
    %c0_1 = arith.constant 0 : index
    %c0_2 = arith.constant 0 : index
    %1 = vector.load %arg2[%c0_1, %c0_2] : memref<1x128xf32, #tpu.memory_space<vmem>>, vector<1x128xf32>
    tpu.vector_store %arg2[%c0_1, %c0_2], %0 {strides = array<i32>} : memref<1x128xf32, #tpu.memory_space<vmem>>, vector<1x128xf32>,
    return
  }
  func.func @transform_0(%arg0: i32) -> (i32, i32) {
    %c0_i32 = arith.constant 0 : i32
    %c0_i32_0 = arith.constant 0 : i32
    return %arg0, %c0_i32 : i32, i32
  }
  func.func @transform_1(%arg0: i32) -> (i32, i32) {
    %c0_i32 = arith.constant 0 : i32
    %c0_i32_0 = arith.constant 0 : i32
    return %arg0, %c0_i32 : i32, i32
  }
}

</mosaic_0001>

<bundles_post_ra>
// kernel: tpu_custom_call.1
= control target key start
LH: loop header
LB: loop body
LE: loop exit
PB: predicated region body
PF: predicated region fallthrough
CT: control target
= control target key end

     0   :  { %6 = vsyncpa [#allocation3], 0  ;;  %s124_s0 = inlined_call_operand.hbm [shape: f32[1,128], index: 0, kind: input, shape index: {}, may-alias: {0,1}]   ;;  %s125_s1 = inlined_call_operand.hbm [shape: f32[1,128], index: 1, kind: output, shape index: {}, may-alias: {0,1}]  }
   0x1   :  { %7 = vsyncpa [#allocation4], 0  ;;  %s88_s6 = smov [#allocation2]   ;;  %s40_s10 = scalar_lea.hbm %s124_s0, 16 }
   0x2   :  { %s14_s7 = sshll.u32 %s88_s6, 4  ;;  %p41_p0 = scmp.ne.s32.totalorder %s124_s0, %s40_s10  ;;  %s15_s7 = int_to_ptr.vmem [resolvable:$true] %s14_s7 }
   0x3   :  { %p44_p1 = scmp.lt.u32.totalorder %s40_s10, %s124_s0 }
   0x5   :  { %p46_p2 = pnand %p44_p1, %p41_p0 }
   0x7   :  { %49 = shalt.err (!%p46_p2)
}
   0x8   :  { %s50_s15 = scalar_lea.vmem %s15_s7, 16  ;;  %s54_s16 = scalar_lea.vmem %s15_s7, 32 }
   0x9   :  { %p51_p3 = scmp.ne.s32.totalorder %s15_s7, %s50_s15  ;;  %p55_p4 = scmp.lt.s32.totalorder %s15_s7, %s15_s7 }
   0xa   :  { %p56_p5 = scmp.lt.s32.totalorder %s54_s16, %s50_s15 }
   0xc   :  { %p57_p6 = por %p56_p5, %p55_p4 }
   0xe   :  { %p58_p7 = pnand %p57_p6, %p51_p3 }
  0x10   :  { %61 = shalt.err (!%p58_p7)
}
  0x11   :  { %17 = dma.hbm_to_vmem [thread:$0]  %s124_s0, 16, %s15_s7, [#allocation3]  }
  0x12   :  { %84 = dma.done.wait [#allocation3], 16  }
  0x13   :  { %85 = vsyncadd [#allocation3], 4294967280  ;;  %s89_s19 = smov [#allocation5]   ;;  %v21_v0 = vld [vmem:[#allocation2] sm:$0x1] }
  0x14   :  { %s29_s20 = sshll.u32 %s89_s19, 4  ;;  %22 = vst [vmem:[#allocation5] sm:$0x1] %v21_v0  ;;  %s30_s20 = int_to_ptr.vmem [resolvable:$true] %s29_s20 }
  0x15   :  { %s62_s21 = scalar_lea.vmem %s30_s20, 16  ;;  %s66_s22 = scalar_lea.vmem %s30_s20, 32 }
  0x16   :  { %p63_p8 = scmp.ne.s32.totalorder %s30_s20, %s62_s21  ;;  %p67_p9 = scmp.lt.s32.totalorder %s30_s20, %s30_s20 }
  0x17   :  { %p68_p10 = scmp.lt.s32.totalorder %s66_s22, %s62_s21 }
  0x19   :  { %p69_p11 = por %p68_p10, %p67_p9 }
  0x1b   :  { %p70_p12 = pnand %p69_p11, %p63_p8 }
  0x1d   :  { %73 = shalt.err (!%p70_p12)
}
  0x1e   :  { %s74_s25 = scalar_lea.hbm %s125_s1, 16 }
  0x1f   :  { %p75_p13 = scmp.ne.s32.totalorder %s125_s1, %s74_s25  ;;  %p78_p0 = scmp.lt.u32.totalorder %s74_s25, %s125_s1 }
  0x21   :  { %p80_p1 = pnand %p78_p0, %p75_p13 }
  0x23   :  { %83 = shalt.err (!%p80_p1)
}
  0x24   :  { %32 = dma.vmem_to_hbm [thread:$0]  %s30_s20, 16, %s125_s1, [#allocation4]  }
  0x25   :  { %86 = dma.done.wait [#allocation4], 16  }
  0x26   :  { %87 = vsyncadd [#allocation4], 4294967280 }
  0x27   :  { %36 = vsyncpa [#allocation3], 1 }
  0x28   :  { %37 = vsyncpa [#allocation4], 1 }

</bundles_post_ra>
